<compile_context>
chip_gen: v7x
topology: tpu7x:2x2x1
jax: 0.10.0
libtpu: 0.0.40
codegen_flags: <defaults>
</compile_context>

<pallas_src>
import functools

import numpy as np
import jax
import jax.numpy as jnp
from jax.experimental import pallas as pl
from jax.experimental.pallas import tpu as pltpu


_TILE_T_CAP = 8192  # frames per grid step; ~1 MiB/input buffer at f32 -> safe on v7x's VMEM too


def _cdiv(a: int, b: int) -> int:
    return -(-a // b)


def _plan_time_tiling(T: int, cap: int = _TILE_T_CAP):
    """Pick (tile_t, num_tiles, padded_T) with tile_t a multiple of 128 (lane-dense writeback)."""
    t128 = _cdiv(T, 128) * 128
    num_tiles = _cdiv(t128, cap)
    tile_t = _cdiv(_cdiv(t128, num_tiles), 128) * 128
    return tile_t, num_tiles, tile_t * num_tiles


def _needs_f32_compare(dtype) -> bool:
    """Upcast inside the kernel only where required (v5e: no native bf16 VPU) or for odd dtypes."""
    if dtype == jnp.float32:
        return False
    if dtype == jnp.bfloat16:
        kind = jax.devices()[0].device_kind.lower()
        return "v5" in kind  # v6e / v7x: compare directly in bf16 (ordering + ties identical)
    return True  # any other dtype: exact, portable f32 compare


def _greedy_ctc_argmax_kernel(e_ref, idx_ref, *, upcast: bool):
    """e_ref: (1, L, tile_t) emission block (labels on sublanes, time on lanes).
    idx_ref: (1, 1, tile_t) int32 per-frame argmax (time on lanes -> full-width stores)."""
    e = e_ref[0]                                   # (L, tile_t)
    if upcast and e.dtype != jnp.float32:
        e = e.astype(jnp.float32)                  # exact in-vreg upcast (only where needed)
    nl, tt = e.shape

    # Argmax over the label (sublane) axis, first-occurrence tie-break like torch argmax.
    # L=29 is the full logical extent of this axis, so the reduces only see logical rows;
    # no padded-lane/MXU-K masking concerns remain in this layout.
    lab = jax.lax.broadcasted_iota(jnp.int32, (nl, tt), 0)
    col_max = jnp.max(e, axis=0, keepdims=True)                    # (1, tt) sublane reduce (XLU)
    cand = jnp.where(e == col_max, lab, jnp.int32(nl))
    idx_ref[0] = jnp.min(cand, axis=0, keepdims=True)              # (1, tt) lane-dense int32 store


def greedy_ctc_argmax(emission: jax.Array) -> jax.Array:
    """Per-frame argmax over labels. emission: (T, L) or (B, T, L) -> int32 (T,) / (B, T)."""
    squeeze = emission.ndim == 2
    if squeeze:
        emission = emission[None]
    B, T, L = emission.shape
    tile_t, num_tiles, t_pad = _plan_time_tiling(T)

    # (B, T, L) -> (B, L, T_pad): time on the lane axis. One cheap wrapper transpose; padded
    # frames are trimmed on the host, so their (all-zero) argmax never matters.
    e_lt = jnp.swapaxes(emission, 1, 2)
    if t_pad != T:
        e_lt = jnp.pad(e_lt, ((0, 0), (0, 0), (0, t_pad - T)))

    kernel = functools.partial(_greedy_ctc_argmax_kernel,
                               upcast=_needs_f32_compare(e_lt.dtype))
    idx = pl.pallas_call(
        kernel,
        out_shape=jax.ShapeDtypeStruct((B, 1, t_pad), jnp.int32),
        grid=(B, num_tiles),
        in_specs=[pl.BlockSpec((1, L, tile_t), lambda b, t: (b, 0, t))],
        out_specs=pl.BlockSpec((1, 1, tile_t), lambda b, t: (b, 0, t)),
        compiler_params=pltpu.CompilerParams(
            dimension_semantics=("parallel", "parallel")),  # independent tiles -> v7x 2-TC split
    )(e_lt)

    idx = idx[:, 0, :T]
    return idx[0] if squeeze else idx


def _collapse_and_join(frames: np.ndarray, labels, blank: int) -> str:
    """Vectorized host glue: unique_consecutive -> drop blank -> join -> '|'->' ' -> strip."""
    frames = np.asarray(frames, dtype=np.int64)
    if frames.size == 0:
        return ""
    keep = np.empty(frames.shape, dtype=bool)
    keep[0] = True
    keep[1:] = frames[1:] != frames[:-1]
    kept = frames[keep]
    kept = kept[kept != blank]
    joined = "".join(labels[i] for i in kept.tolist())
    return joined.replace("|", " ").strip()


def greedy_ctc_decode(emission: jax.Array, labels, blank: int = 0):
    """Pallas equivalent of GreedyCTCDecoder.forward for one utterance. Returns List[str]."""
    idx = greedy_ctc_argmax(emission)          # (T,) int32 on device
    frames = np.asarray(idx)                   # device->host (sync happens here)
    return [_collapse_and_join(frames, labels, blank)]


def greedy_ctc_decode_batch(emissions: jax.Array, labels, blank: int = 0):
    """Decode a stacked batch (B, T, L) with ONE pallas_call (amortizes launch + sync)."""
    idx = np.asarray(greedy_ctc_argmax(emissions))   # (B, T)
    return [_collapse_and_join(idx[b], labels, blank) for b in range(idx.shape[0])]


def _reference_decode(emission_np: np.ndarray, labels, blank: int = 0):
    """Pure-numpy reference mirroring the PyTorch forward semantics."""
    indices = np.argmax(emission_np, axis=-1)
    dedup = [int(indices[0])]
    for t in range(1, len(indices)):
        if indices[t] != indices[t - 1]:
            dedup.append(int(indices[t]))
    kept = [i for i in dedup if i != blank]
    joined = "".join(labels[i] for i in kept)
    return [joined.replace("|", " ").strip()]


if __name__ == "__main__":
    # torchaudio-style HuBERT CTC label set: blank '-', word sep '|', then characters.
    LABELS = ['-', '|', 'E', 'T', 'A', 'O', 'N', 'I', 'H', 'S', 'R', 'D', 'L', 'U',
              'M', 'W', 'C', 'F', 'G', 'Y', 'P', 'B', 'V', 'K', "'", 'X', 'J', 'Q', 'Z']
    L = len(LABELS)

    key = jax.random.PRNGKey(0)
    k1, k2, k3 = jax.random.split(key, 3)

    # Case 1: f32 emission, T = 1024 -> single fat tile; check raw argmax + decode.
    T1 = 1024
    em_f32 = jax.random.normal(k1, (T1, L), dtype=jnp.float32)
    idx1 = greedy_ctc_argmax(em_f32)
    jax.block_until_ready(idx1)
    assert np.array_equal(np.asarray(idx1), np.argmax(np.asarray(em_f32), axis=-1)), "argmax mismatch"
    out1 = greedy_ctc_decode(em_f32, LABELS, blank=0)
    ref1 = _reference_decode(np.asarray(em_f32), LABELS, blank=0)
    assert out1 == ref1, f"f32 mismatch: kernel={out1!r} ref={ref1!r}"

    # Case 2: bf16 emission (model-native dtype), T = 637 (non-multiple of 128 -> padding path).
    T2 = 637
    em_bf16 = jax.random.normal(k2, (T2, L), dtype=jnp.float32).astype(jnp.bfloat16)
    out2 = greedy_ctc_decode(em_bf16, LABELS, blank=0)
    ref2 = _reference_decode(np.asarray(em_bf16.astype(jnp.float32)), LABELS, blank=0)
    assert out2 == ref2, f"bf16 mismatch: kernel={out2!r} ref={ref2!r}"

    # Case 3: batched utterances in one pallas_call over a (B, num_T_tiles) grid.
    B, T3 = 3, 512
    em_batch = jax.random.normal(k3, (B, T3, L), dtype=jnp.float32)
    out3 = greedy_ctc_decode_batch(em_batch, LABELS, blank=0)
    ref3 = [_reference_decode(np.asarray(em_batch[b]), LABELS, blank=0)[0] for b in range(B)]
    assert out3 == ref3, f"batch mismatch: kernel={out3!r} ref={ref3!r}"

    print("KERNEL_OK")
</pallas_src>

<mosaic_0001>
module attributes {stable_mosaic.version = 11 : i64} {
  func.func @_greedy_ctc_argmax_kernel(%arg0: i32, %arg1: i32, %arg2: memref<1x29x1024xf32, #tpu.memory_space<vmem>>, %arg3: memref<1x1x1024xi32, #tpu.memory_space<vmem>>) attributes {dimension_semantics = [#tpu.dimension_semantics<parallel>, #tpu.dimension_semantics<parallel>], iteration_bounds = array<i64: 1, 1>, scalar_prefetch = 0 : i64, scratch_operands = 0 : i64, tpu.core_type = #tpu.core_type<tc>, window_params = [{transform_indices = @transform_0, window_bounds = array<i64: 1, 29, 1024>}, {transform_indices = @transform_1, window_bounds = array<i64: 1, 1, 1024>}]} {
    %c0 = arith.constant 0 : index
    %c0_0 = arith.constant 0 : index
    %c0_1 = arith.constant 0 : index
    %0 = vector.load %arg2[%c0, %c0_0, %c0_1] : memref<1x29x1024xf32, #tpu.memory_space<vmem>>, vector<1x29x1024xf32>
    %1 = vector.shape_cast %0 : vector<1x29x1024xf32> to vector<29x1024xf32>
    %2 = tpu.iota {dimensions = array<i32: 0>} : vector<29x1024xi32>
    %cst = arith.constant dense<0xFF800000> : vector<1024xf32>
    %3 = vector.multi_reduction <maximumf>, %1, %cst [0] : vector<29x1024xf32> to vector<1024xf32>
    %4 = vector.shape_cast %3 : vector<1024xf32> to vector<1x1024xf32>
    %5 = vector.broadcast %4 : vector<1x1024xf32> to vector<29x1024xf32>
    %6 = arith.cmpf oeq, %1, %5 : vector<29x1024xf32>
    %c29_i32 = arith.constant 29 : i32
    %7 = vector.broadcast %c29_i32 : i32 to vector<29x1024xi32>
    %8 = arith.select %6, %2, %7 : vector<29x1024xi1>, vector<29x1024xi32>
    %cst_2 = arith.constant dense<2147483647> : vector<1024xi32>
    %9 = vector.multi_reduction <minsi>, %8, %cst_2 [0] : vector<29x1024xi32> to vector<1024xi32>
    %10 = vector.shape_cast %9 : vector<1024xi32> to vector<1x1024xi32>
    %c0_3 = arith.constant 0 : index
    %c0_4 = arith.constant 0 : index
    %c0_5 = arith.constant 0 : index
    %11 = vector.load %arg3[%c0_3, %c0_4, %c0_5] : memref<1x1x1024xi32, #tpu.memory_space<vmem>>, vector<1x1x1024xi32>
    %12 = vector.shape_cast %11 : vector<1x1x1024xi32> to vector<1x1024xi32>
    %13 = vector.shape_cast %10 : vector<1x1024xi32> to vector<1x1x1024xi32>
    tpu.vector_store %arg3[%c0_3, %c0_4, %c0_5], %13 {strides = array<i32>} : memref<1x1x1024xi32, #tpu.memory_space<vmem>>, vector<1x1x1024xi32>,
    return
  }
  func.func @transform_0(%arg0: i32, %arg1: i32) -> (i32, i32, i32) {
    %c0_i32 = arith.constant 0 : i32
    %c0_i32_0 = arith.constant 0 : i32
    return %arg0, %c0_i32, %arg1 : i32, i32, i32
  }
  func.func @transform_1(%arg0: i32, %arg1: i32) -> (i32, i32, i32) {
    %c0_i32 = arith.constant 0 : i32
    %c0_i32_0 = arith.constant 0 : i32
    return %arg0, %c0_i32, %arg1 : i32, i32, i32
  }
}

</mosaic_0001>

<bundles_post_ra>
// kernel: tpu_custom_call.1
= control target key start
LH: loop header
LB: loop body
LE: loop exit
PB: predicated region body
PF: predicated region fallthrough
CT: control target
= control target key end

     0   :  { %6 = vsyncpa [#allocation3], 0  ;;  %vm894_vm0 = vcmask 1044480   ;;  %v41_v41 = vlaneseq  ;;  %s882_s0 = inlined_call_operand.vmem [shape: f32[1,29,1024], index: 0, kind: input, shape index: {}]   ;;  %s883_s1 = inlined_call_operand.hbm [shape: s32[1,1,1024], index: 1, kind: output, shape index: {}]  }
   0x1   :  { %v424_v0 = vld [vmem:[%s882_s0] sm:$0xff]  ;;  %v429_v1 = vld [vmem:[%s882_s0 + $0x8] sm:$0xff]  ;;  %v434_v2 = vld [vmem:[%s882_s0 + $0x10] sm:$0xff] }
   0x2   :  { %v439_v3 = vld [vmem:[%s882_s0 + $0x18] sm:$0xff]  ;;  %v444_v4 = vld [vmem:[%s882_s0 + $0x20] sm:$0xff]  ;;  %v449_v5 = vld [vmem:[%s882_s0 + $0x28] sm:$0xff] }
   0x3   :  { %v454_v6 = vld [vmem:[%s882_s0 + $0x30] sm:$0xff]  ;;  %v459_v7 = vld [vmem:[%s882_s0 + $0x38] sm:$0xff]  ;;  %v464_v8 = vld [vmem:[%s882_s0 + $0x40] sm:$0xff] }
   0x4   :  { %v469_v9 = vld [vmem:[%s882_s0 + $0x48] sm:$0xff]  ;;  %v474_v10 = vld [vmem:[%s882_s0 + $0x50] sm:$0xff]  ;;  %v479_v11 = vld [vmem:[%s882_s0 + $0x58] sm:$0xff]  ;;  %v46_v14 = vmax.f32 %v424_v0, %v464_v8 }
   0x5   :  { %v484_v12 = vld [vmem:[%s882_s0 + $0x60] sm:$0xff]  ;;  %v489_v13 = vld [vmem:[%s882_s0 + $0x68] sm:$0xff]  ;;  %v496_v15 = vld [vmem:[%s882_s0 + $0x70] sm:$0xff]  ;;  %v57_v18 = vmax.f32 %v429_v1, %v469_v9  ;;  %v67_v19 = vmax.f32 %v434_v2, %v474_v10  ;;  %v77_v20 = vmax.f32 %v439_v3, %v479_v11 }
   0x6   :  { %v501_v16 = vld [vmem:[%s882_s0 + $0x78] sm:$0xff]  ;;  %v506_v17 = vld [vmem:[%s882_s0 + $0x80] sm:$0xff]  ;;  %v517_v21 = vld [vmem:[%s882_s0 + $0x88] sm:$0xff]  ;;  %v87_v24 = vmax.f32 %v444_v4, %v484_v12  ;;  %v97_v25 = vmax.f32 %v449_v5, %v489_v13  ;;  %v107_v26 = vmax.f32 %v454_v6, %v496_v15 }
   0x7   :  { %895 = vst [vmem:[#allocation5_spill] sm:$0xff] %v501_v16  ;;  %v522_v22 = vld [vmem:[%s882_s0 + $0x90] sm:$0xff]  ;;  %v527_v23 = vld [vmem:[%s882_s0 + $0x98] sm:$0xff]  ;;  %v117_v27 = vmax.f32 %v459_v7, %v501_v16  ;;  %v540_v28 = vld [vmem:[%s882_s0 + $0xa0] sm:$0xff]  ;;  %v47_v34 = vmax.f32 %v46_v14, %v506_v17  ;;  %v58_v35 = vmax.f32 %v57_v18, %v517_v21 }
   0x8   :  { %v545_v29 = vld [vmem:[%s882_s0 + $0xa8] sm:$0xff]  ;;  %v550_v30 = vld [vmem:[%s882_s0 + $0xb0] sm:$0xff]  ;;  %v555_v31 = vld [vmem:[%s882_s0 + $0xb8] sm:$0xff]  ;;  %v68_v36 = vmax.f32 %v67_v19, %v522_v22  ;;  %v78_v37 = vmax.f32 %v77_v20, %v527_v23  ;;  %v88_v45 = vmax.f32 %v87_v24, %v540_v28 }
   0x9   :  { %896 = vst [vmem:[#allocation6_spill] sm:$0xff] %v550_v30  ;;  %897 = vst [vmem:[#allocation7_spill] sm:$0xff] %v555_v31  ;;  %v560_v32 = vld [vmem:[%s882_s0 + $0xc0] sm:$0x1f]  ;;  %v565_v33 = vld [vmem:[%s882_s0 + $0xc8] sm:$0x1f]  ;;  %v98_v46 = vmax.f32 %v97_v25, %v545_v29  ;;  %v108_v47 = vmax.f32 %v107_v26, %v550_v30  ;;  %v118_v48 = vmax.f32 %v117_v27, %v555_v31 }
   0xa   :  { %v574_v38 = vld [vmem:[%s882_s0 + $0xd0] sm:$0x1f]  ;;  %v579_v39 = vld [vmem:[%s882_s0 + $0xd8] sm:$0x1f]  ;;  %v584_v40 = vld [vmem:[%s882_s0 + $0xe0] sm:$0x1f] }
   0xb   :  { %v589_v42 = vld [vmem:[%s882_s0 + $0xe8] sm:$0x1f]  ;;  %v594_v43 = vld [vmem:[%s882_s0 + $0xf0] sm:$0x1f]  ;;  %v599_v44 = vld [vmem:[%s882_s0 + $0xf8] sm:$0x1f] }
   0xc   :  { %898 = vst [vmem:[#allocation8_spill] sm:$0xff] %v594_v43  ;;  %899 = vst [vmem:[#allocation9_spill] sm:$0xff] %v599_v44  ;;  %v49_v49 = vsel %vm894_vm0, %v560_v32, -inf  ;;  %v59_v50 = vsel %vm894_vm0, %v565_v33, -inf  ;;  %v69_v51 = vsel %vm894_vm0, %v574_v38, -inf  ;;  %v79_v52 = vsel %vm894_vm0, %v579_v39, -inf }
   0xd   :  { %v50_v53 = vmax.f32 %v47_v34, %v49_v49  ;;  %v60_v54 = vmax.f32 %v58_v35, %v59_v50  ;;  %v70_v55 = vmax.f32 %v68_v36, %v69_v51  ;;  %v80_v56 = vmax.f32 %v78_v37, %v79_v52  ;;  %s410_s0 = smov [#allocation2]  }
   0xe   :  { %v89_v57 = vsel %vm894_vm0, %v584_v40, -inf  ;;  %v99_v58 = vsel %vm894_vm0, %v589_v42, -inf  ;;  %v109_v59 = vsel %vm894_vm0, %v594_v43, -inf  ;;  %v119_v60 = vsel %vm894_vm0, %v599_v44, -inf  ;;  %s375_s12 = sshll.u32 %s410_s0, 4  ;;  %s376_s12 = int_to_ptr.vmem [resolvable:$true] %s375_s12 }
   0xf   :  { %v51_v61 = vrot.slane %v50_v53, 4  ;;  %v61_v62 = vrot.slane %v60_v54, 4  ;;  %v71_v63 = vrot.slane %v70_v55, 4  ;;  %v81_v14 = vrot.slane %v80_v56, 4  ;;  %s385_s13 = scalar_lea.vmem %s376_s12, 128  ;;  %p390_p1 = scmp.lt.s32.totalorder %s376_s12, %s376_s12 }
  0x10   :  { %v90_v18 = vmax.f32 %v88_v45, %v89_v57  ;;  %v100_v19 = vmax.f32 %v98_v46, %v99_v58  ;;  %v110_v20 = vmax.f32 %v108_v47, %v109_v59  ;;  %v120_v24 = vmax.f32 %v118_v48, %v119_v60  ;;  %p386_p0 = scmp.ne.s32.totalorder %s376_s12, %s385_s13  ;;  %p391_p2 = scmp.lt.s32.totalorder %s385_s13, %s385_s13 }
  0x11   :  { %v52_v25 = vmax.f32 %v50_v53, %v51_v61  ;;  %v62_v26 = vmax.f32 %v60_v54, %v61_v62  ;;  %v72_v27 = vmax.f32 %v70_v55, %v71_v63  ;;  %v82_v34 = vmax.f32 %v80_v56, %v81_v14 }
  0x12   :  { %v91_v35 = vrot.slane %v90_v18, 4  ;;  %v101_v36 = vrot.slane %v100_v19, 4  ;;  %v111_v37 = vrot.slane %v110_v20, 4  ;;  %v121_v49 = vrot.slane %v120_v24, 4  ;;  %p392_p3 = por %p391_p2, %p390_p1 }
  0x13   :  { %v53_v50 = vrot.slane %v52_v25, 2  ;;  %v63_v51 = vrot.slane %v62_v26, 2  ;;  %v73_v52 = vrot.slane %v72_v27, 2  ;;  %v83_v44 = vrot.slane %v82_v34, 2 }
  0x14   :  { %v92_v43 = vmax.f32 %v90_v18, %v91_v35  ;;  %v102_v31 = vmax.f32 %v100_v19, %v101_v36  ;;  %v112_v30 = vmax.f32 %v110_v20, %v111_v37  ;;  %v122_v16 = vmax.f32 %v120_v24, %v121_v49  ;;  %p393_p4 = pnand %p392_p3, %p386_p0 }
  0x15   :  { %v54_v45 = vmax.f32 %v52_v25, %v53_v50  ;;  %v64_v46 = vmax.f32 %v62_v26, %v63_v51  ;;  %v74_v47 = vmax.f32 %v72_v27, %v73_v52  ;;  %v84_v48 = vmax.f32 %v82_v34, %v83_v44 }
  0x16   :  { %v93_v53 = vrot.slane %v92_v43, 2  ;;  %v103_v54 = vrot.slane %v102_v31, 2  ;;  %v113_v55 = vrot.slane %v112_v30, 2  ;;  %v123_v56 = vrot.slane %v122_v16, 2 }
  0x17   :  { %v55_v57 = vrot.slane %v54_v45, 1  ;;  %v65_v58 = vrot.slane %v64_v46, 1  ;;  %v75_v59 = vrot.slane %v74_v47, 1  ;;  %v85_v60 = vrot.slane %v84_v48, 1 }
  0x18   :  { %v94_v61 = vmax.f32 %v92_v43, %v93_v53  ;;  %v104_v62 = vmax.f32 %v102_v31, %v103_v54  ;;  %v114_v63 = vmax.f32 %v112_v30, %v113_v55  ;;  %v124_v14 = vmax.f32 %v122_v16, %v123_v56  ;;  %v914_v56 = vld [vmem:[#allocation5_spill] sm:$0xff] }
  0x19   :  { %v621_v18 = vshrl.u32 %v41_v41, 7  ;;  %v623_v19 = vmax.f32 %v54_v45, %v55_v57  ;;  %v625_v20 = vmax.f32 %v64_v46, %v65_v58  ;;  %v76_v27 = vmax.f32 %v74_v47, %v75_v59  ;;  %v915_v57 = vld [vmem:[#allocation6_spill] sm:$0xff]  ;;  %v916_v58 = vld [vmem:[#allocation7_spill] sm:$0xff] }
  0x1a   :  { %v95_v24 = vrot.slane %v94_v61, 1  ;;  %v105_v44 = vrot.slane %v104_v62, 1  ;;  %v115_v25 = vrot.slane %v114_v63, 1  ;;  %v125_v26 = vrot.slane %v124_v14, 1 }
  0x1b   :  { %v86_v34 = vmax.f32 %v84_v48, %v85_v60  ;;  %v628_v37 = vadd.s32 8, %v621_v18  ;;  %v409_v30 = vmov 1966171168   ;;  %v637_v43 = vadd.s32 16, %v621_v18 }
  0x1c   :  { %v96_v35 = vmax.f32 %v94_v61, %v95_v24  ;;  %v106_v36 = vmax.f32 %v104_v62, %v105_v44  ;;  %v630_v31 = vmax.f32 %v114_v63, %v115_v25  ;;  %v632_v16 = vmax.f32 %v124_v14, %v125_v26  ;;  %v917_v62 = vld [vmem:[#allocation8_spill] sm:$0xff]  ;;  %v918_v63 = vld [vmem:[#allocation9_spill] sm:$0xff] }
  0x1d   :  { %v634_v41 = vunpack.c.l.s4 %v409_v30  ;;  %v640_v49 = vadd.s32 24, %v621_v18  ;;  %vm127_vm1 = vcmp.eq.f32.partialorder %v424_v0, %v623_v19  ;;  %vm128_vm2 = vcmp.eq.f32.partialorder %v429_v1, %v625_v20 }
  0x1e   :  { %vm129_vm3 = vcmp.eq.f32.partialorder %v434_v2, %v76_v27  ;;  %vm130_vm4 = vcmp.eq.f32.partialorder %v439_v3, %v86_v34  ;;  %vm131_vm7 = vcmp.eq.f32.partialorder %v444_v4, %v96_v35  ;;  %vm132_vm8 = vcmp.eq.f32.partialorder %v449_v5, %v106_v36 }
  0x1f   :  { %vm133_vm11 = vcmp.eq.f32.partialorder %v454_v6, %v630_v31  ;;  %vm146_vm6 = vcmp.eq.f32.partialorder %v527_v23, %v86_v34  ;;  %vm147_vm5 = vcmp.eq.f32.partialorder %v540_v28, %v96_v35  ;;  %vm148_vm12 = vcmp.eq.f32.partialorder %v545_v29, %v106_v36 }
  0x20   :  { %vm151_vm14 = vcmp.eq.f32.partialorder %v560_v32, %v623_v19  ;;  %vm152_vm15 = vcmp.eq.f32.partialorder %v565_v33, %v625_v20  ;;  %vm153_vm13 = vcmp.eq.f32.partialorder %v574_v38, %v76_v27  ;;  %vm154_vm0 = vcmp.eq.f32.partialorder %v579_v39, %v86_v34 }
  0x21   :  { %vm155_vm9 = vcmp.eq.f32.partialorder %v584_v40, %v96_v35  ;;  %vm156_vm10 = vcmp.eq.f32.partialorder %v589_v42, %v106_v36  ;;  %v159_v50 = vsel %vm127_vm1, %v621_v18, 29  ;;  %v160_v51 = vsel %vm128_vm2, %v621_v18, 29 }
  0x22   :  { %v161_v52 = vsel %vm129_vm3, %v621_v18, 29  ;;  %v162_v45 = vsel %vm130_vm4, %v621_v18, 29  ;;  %v697_v46 = vsel %vm131_vm7, %v621_v18, 29  ;;  %v702_v0 = vsel %vm132_vm8, %v621_v18, 29 }
  0x23   :  { %v708_v1 = vsel %vm133_vm11, %v621_v18, 29  ;;  %vm900_vm1 = vcmp.eq.f32.partialorder %v459_v7, %v632_v16  ;;  %vm901_vm2 = vcmp.eq.f32.partialorder %v464_v8, %v623_v19  ;;  %vm902_vm3 = vcmp.eq.f32.partialorder %v469_v9, %v625_v20 }
  0x24   :  { %v714_v2 = vsel %vm900_vm1, %v621_v18, 29  ;;  %v167_v3 = vsel %vm901_vm2, %v628_v37, 29  ;;  %v168_v4 = vsel %vm902_vm3, %v628_v37, 29  ;;  %vm903_vm4 = vcmp.eq.f32.partialorder %v474_v10, %v76_v27 }
  0x25   :  { %v169_v5 = vsel %vm903_vm4, %v628_v37, 29  ;;  %vm904_vm7 = vcmp.eq.f32.partialorder %v479_v11, %v86_v34  ;;  %vm905_vm8 = vcmp.eq.f32.partialorder %v484_v12, %v96_v35  ;;  %vm906_vm11 = vcmp.eq.f32.partialorder %v489_v13, %v106_v36 }
  0x26   :  { %v170_v6 = vsel %vm904_vm7, %v628_v37, 29  ;;  %v171_v7 = vsel %vm905_vm8, %v628_v37, 29  ;;  %v736_v8 = vsel %vm906_vm11, %v628_v37, 29  ;;  %vm907_vm1 = vcmp.eq.f32.partialorder %v496_v15, %v630_v31 }
  0x27   :  { %v742_v9 = vsel %vm907_vm1, %v628_v37, 29  ;;  %vm908_vm2 = vcmp.eq.f32.partialorder %v506_v17, %v623_v19  ;;  %vm909_vm3 = vcmp.eq.f32.partialorder %v517_v21, %v625_v20  ;;  %vm910_vm4 = vcmp.eq.f32.partialorder %v522_v22, %v76_v27 }
  0x28   :  { %v175_v10 = vsel %vm908_vm2, %v637_v43, 29  ;;  %v176_v11 = vsel %vm909_vm3, %v637_v43, 29  ;;  %v177_v12 = vsel %vm910_vm4, %v637_v43, 29  ;;  %v178_v13 = vsel %vm146_vm6, %v637_v43, 29 }
  0x29   :  { %v179_v15 = vsel %vm147_vm5, %v637_v43, 29  ;;  %v183_v17 = vsel %vm151_vm14, %v640_v49, 29  ;;  %v184_v21 = vsel %vm152_vm15, %v640_v49, 29  ;;  %v185_v22 = vsel %vm153_vm13, %v640_v49, 29 }
  0x2a   :  { %v775_v23 = vsel %vm148_vm12, %v637_v43, 29  ;;  %v186_v28 = vsel %vm154_vm0, %v640_v49, 29  ;;  %v187_v32 = vsel %vm155_vm9, %v640_v49, 29  ;;  %v786_v33 = vsel %vm156_vm10, %v640_v49, 29 }
  0x2b   :  { %vm191_vm5 = vcmp.lt.s32.totalorder %v159_v50, %v167_v3  ;;  %vm911_vm6 = vcmask 1044480   ;;  %vm207_vm13 = vcmp.lt.s32.totalorder %v160_v51, %v168_v4  ;;  %vm223_vm12 = vcmp.lt.s32.totalorder %v161_v52, %v169_v5 }
  0x2c   :  { %v195_v38 = vsel %vm911_vm6, %v183_v17, 2147483647  ;;  %vm912_vm14 = vmmov %vm911_vm6  ;;  %v192_v47 = vsel %vm191_vm5, %v159_v50, %v167_v3  ;;  %v208_v48 = vsel %vm207_vm13, %v160_v51, %v168_v4  ;;  %v224_v40 = vsel %vm223_vm12, %v161_v52, %v169_v5 }
  0x2d   :  { %v211_v29 = vsel %vm912_vm14, %v184_v21, 2147483647  ;;  %vm913_vm15 = vmmov %vm911_vm6  ;;  %vm193_vm0 = vcmp.lt.s32.totalorder %v192_v47, %v175_v10  ;;  %vm209_vm7 = vcmp.lt.s32.totalorder %v208_v48, %v176_v11  ;;  %vm239_vm9 = vcmp.lt.s32.totalorder %v162_v45, %v170_v6 }
  0x2e   :  { %v227_v39 = vsel %vm913_vm15, %v185_v22, 2147483647  ;;  %v194_v53 = vsel %vm193_vm0, %v192_v47, %v175_v10  ;;  %v210_v54 = vsel %vm209_vm7, %v208_v48, %v176_v11  ;;  %vm225_vm8 = vcmp.lt.s32.totalorder %v224_v40, %v177_v12  ;;  %vm919_vm0 = vmmov %vm912_vm14 }
  0x2f   :  { %v240_v42 = vsel %vm239_vm9, %v162_v45, %v170_v6  ;;  %vm196_vm10 = vcmp.lt.s32.totalorder %v194_v53, %v195_v38  ;;  %vm212_vm11 = vcmp.lt.s32.totalorder %v210_v54, %v211_v29  ;;  %v226_v55 = vsel %vm225_vm8, %v224_v40, %v177_v12 }
  0x30   :  { %vm241_vm1 = vcmp.lt.s32.totalorder %v240_v42, %v178_v13  ;;  %vm142_vm2 = vcmp.eq.f32.partialorder %v914_v56, %v632_v16  ;;  %vm149_vm3 = vcmp.eq.f32.partialorder %v915_v57, %v630_v31  ;;  %vm150_vm4 = vcmp.eq.f32.partialorder %v916_v58, %v632_v16 }
  0x31   :  { %v197_v59 = vsel %vm196_vm10, %v194_v53, %v195_v38  ;;  %v213_v60 = vsel %vm212_vm11, %v210_v54, %v211_v29  ;;  %vm228_vm5 = vcmp.lt.s32.totalorder %v226_v55, %v227_v39  ;;  %v242_v61 = vsel %vm241_vm1, %v240_v42, %v178_v13 }
  0x32   :  { %vm157_vm6 = vcmp.eq.f32.partialorder %v917_v62, %v630_v31  ;;  %vm158_vm13 = vcmp.eq.f32.partialorder %v918_v63, %v632_v16  ;;  %v198_v14 = vrot.slane %v197_v59, 4  ;;  %v214_v19 = vrot.slane %v213_v60, 4 }
  0x33   :  { %v229_v20 = vsel %vm228_vm5, %v226_v55, %v227_v39  ;;  %v243_v24 = vsel %vm912_vm14, %v186_v28, 2147483647  ;;  %vm255_vm15 = vcmp.lt.s32.totalorder %v697_v46, %v171_v7  ;;  %v259_v25 = vsel %vm919_vm0, %v187_v32, 2147483647 }
  0x34   :  { %v230_v44 = vrot.slane %v229_v20, 4  ;;  %vm244_vm12 = vcmp.lt.s32.totalorder %v242_v61, %v243_v24  ;;  %vm199_vm7 = vcmp.lt.s32.totalorder %v197_v59, %v198_v14  ;;  %vm215_vm9 = vcmp.lt.s32.totalorder %v213_v60, %v214_v19 }
  0x35   :  { %v245_v26 = vsel %vm244_vm12, %v242_v61, %v243_v24  ;;  %v256_v27 = vsel %vm255_vm15, %v697_v46, %v171_v7  ;;  %v200_v34 = vsel %vm199_vm7, %v197_v59, %v198_v14  ;;  %v216_v35 = vsel %vm215_vm9, %v213_v60, %v214_v19 }
  0x36   :  { %vm231_vm8 = vcmp.lt.s32.totalorder %v229_v20, %v230_v44  ;;  %v246_v36 = vrot.slane %v245_v26, 4  ;;  %v201_v30 = vrot.slane %v200_v34, 2  ;;  %v217_v50 = vrot.slane %v216_v35, 2 }
  0x37   :  { %v232_v51 = vsel %vm231_vm8, %v229_v20, %v230_v44  ;;  %vm257_vm10 = vcmp.lt.s32.totalorder %v256_v27, %v179_v15  ;;  %vm271_vm1 = vcmp.lt.s32.totalorder %v702_v0, %v736_v8  ;;  %v174_v17 = vsel %vm142_vm2, %v628_v37, 29 }
  0x38   :  { %v233_v52 = vrot.slane %v232_v51, 2  ;;  %vm247_vm11 = vcmp.lt.s32.totalorder %v245_v26, %v246_v36  ;;  %v258_v45 = vsel %vm257_vm10, %v256_v27, %v179_v15  ;;  %vm202_vm5 = vcmp.lt.s32.totalorder %v200_v34, %v201_v30 }
  0x39   :  { %vm218_vm14 = vcmp.lt.s32.totalorder %v216_v35, %v217_v50  ;;  %v248_v3 = vsel %vm247_vm11, %v245_v26, %v246_v36  ;;  %vm260_vm12 = vcmp.lt.s32.totalorder %v258_v45, %v259_v25  ;;  %v203_v4 = vsel %vm202_vm5, %v200_v34, %v201_v30 }
  0x3a   :  { %v219_v46 = vsel %vm218_vm14, %v216_v35, %v217_v50  ;;  %vm234_vm15 = vcmp.lt.s32.totalorder %v232_v51, %v233_v52  ;;  %v249_v5 = vrot.slane %v248_v3, 2  ;;  %v204_v6 = vrot.slane %v203_v4, 1 }
  0x3b   :  { %v220_v7 = vrot.slane %v219_v46, 1  ;;  %v235_v10 = vsel %vm234_vm15, %v232_v51, %v233_v52  ;;  %v261_v11 = vsel %vm260_vm12, %v258_v45, %v259_v25  ;;  %v272_v15 = vsel %vm271_vm1, %v702_v0, %v736_v8 }
  0x3c   :  { %v236_v12 = vrot.slane %v235_v10, 1  ;;  %vm250_vm0 = vcmp.lt.s32.totalorder %v248_v3, %v249_v5  ;;  %v262_v13 = vrot.slane %v261_v11, 4  ;;  %v181_v21 = vsel %vm149_vm3, %v637_v43, 29 }
  0x3d   :  { %v182_v22 = vsel %vm150_vm4, %v637_v43, 29  ;;  %vm273_vm7 = vcmp.lt.s32.totalorder %v272_v15, %v775_v23  ;;  %v189_v0 = vsel %vm157_vm6, %v640_v49, 29  ;;  %v190_v37 = vsel %vm158_vm13, %v640_v49, 29 }
  0x3e   :  { %vm833_vm2 = vcmp.lt.s32.totalorder %v203_v4, %v204_v6  ;;  %v251_v28 = vsel %vm250_vm0, %v248_v3, %v249_v5  ;;  %vm837_vm3 = vcmp.lt.s32.totalorder %v219_v46, %v220_v7  ;;  %vm263_vm4 = vcmp.lt.s32.totalorder %v261_v11, %v262_v13 }
  0x3f   :  { %v274_v43 = vsel %vm273_vm7, %v272_v15, %v775_v23  ;;  %vm924_vm9 = vcmask 1044480   ;;  %vm844_vm6 = vcmp.lt.s32.totalorder %v235_v10, %v236_v12  ;;  %v264_v16 = vsel %vm263_vm4, %v261_v11, %v262_v13 }
  0x40   :  { %v275_v31 = vsel %vm924_vm9, %v786_v33, 2147483647  ;;  %vm287_vm8 = vcmp.lt.s32.totalorder %v708_v1, %v742_v9  ;;  %v252_v49 = vrot.slane %v251_v28, 1  ;;  %v265_v29 = vrot.slane %v264_v16, 2  ;;  %vm927_vm11 = vmmov %vm924_vm9 }
  0x41   :  { %vm276_vm13 = vcmp.lt.s32.totalorder %v274_v43, %v275_v31  ;;  %v288_v48 = vsel %vm287_vm8, %v708_v1, %v742_v9  ;;  %v291_v23 = vsel %vm927_vm11, %v189_v0, 2147483647  ;;  %vm303_vm1 = vcmp.lt.s32.totalorder %v714_v2, %v174_v17  ;;  %vm928_vm14 = vmmov %vm924_vm9 }
  0x42   :  { %v277_v47 = vsel %vm276_vm13, %v274_v43, %v275_v31  ;;  %vm289_vm10 = vcmp.lt.s32.totalorder %v288_v48, %v181_v21  ;;  %vm266_vm5 = vcmp.lt.s32.totalorder %v264_v16, %v265_v29  ;;  %v304_v40 = vsel %vm303_vm1, %v714_v2, %v174_v17 }
  0x43   :  { %v278_v39 = vrot.slane %v277_v47, 4  ;;  %v290_v33 = vsel %vm289_vm10, %v288_v48, %v181_v21  ;;  %v307_v53 = vsel %vm928_vm14, %v190_v37, 2147483647  ;;  %v267_v54 = vsel %vm266_vm5, %v264_v16, %v265_v29 }
  0x44   :  { %vm292_vm15 = vcmp.lt.s32.totalorder %v290_v33, %v291_v23  ;;  %vm305_vm0 = vcmp.lt.s32.totalorder %v304_v40, %v182_v22  ;;  %vm856_vm7 = vcmp.lt.s32.totalorder %v251_v28, %v252_v49  ;;  %v268_v56 = vrot.slane %v267_v54, 1 }
  0x45   :  { %vm279_vm12 = vcmp.lt.s32.totalorder %v277_v47, %v278_v39  ;;  %v293_v9 = vsel %vm292_vm15, %v290_v33, %v291_v23  ;;  %v306_v55 = vsel %vm305_vm0, %v304_v40, %v182_v22  ;;  %v206_v2 = vsel %vm833_vm2, %v203_v4, %v204_v6 }
  0x46   :  { %v280_v1 = vsel %vm279_vm12, %v277_v47, %v278_v39  ;;  %v294_v58 = vrot.slane %v293_v9, 4  ;;  %vm308_vm4 = vcmp.lt.s32.totalorder %v306_v55, %v307_v53  ;;  %v325_v60 = vunpack.c.0.s8 %v634_v41 }
  0x47   :  { %v281_v57 = vrot.slane %v280_v1, 2  ;;  %v309_v59 = vsel %vm308_vm4, %v306_v55, %v307_v53  ;;  %v222_v61 = vsel %vm837_vm3, %v219_v46, %v220_v7  ;;  %v238_v63 = vsel %vm844_vm6, %v235_v10, %v236_v12 }
  0x48   :  { %vm295_vm13 = vcmp.lt.s32.totalorder %v293_v9, %v294_v58  ;;  %v310_v62 = vrot.slane %v309_v59, 4  ;;  %v254_v14 = vsel %vm856_vm7, %v251_v28, %v252_v49  ;;  %vm269_vm8 = vcmp.lt.s32.totalorder %v267_v54, %v268_v56 }
  0x49   :  { %vm282_vm9 = vcmp.lt.s32.totalorder %v280_v1, %v281_v57  ;;  %v296_v20 = vsel %vm295_vm13, %v293_v9, %v294_v58  ;;  %v319_v41 = vcombine.low %v206_v2, %v222_v61  ;;  %v328_v26 = vsub.s32 %v325_v60, %v621_v18 }
  0x4a   :  { %v283_v19 = vsel %vm282_vm9, %v280_v1, %v281_v57  ;;  %v297_v44 = vrot.slane %v296_v20, 2  ;;  %vm311_vm2 = vcmp.lt.s32.totalorder %v309_v59, %v310_v62  ;;  %v320_v34 = vcombine.low %v238_v63, %v254_v14 }
  0x4b   :  { %v284_v24 = vrot.slane %v283_v19, 1  ;;  %v312_v25 = vsel %vm311_vm2, %v309_v59, %v310_v62  ;;  %v270_v35 = vsel %vm269_vm8, %v267_v54, %v268_v56  ;;  %v329_v52 = vrot.slane %v319_v41, %v328_v26 }
  0x4c   :  { %vm298_vm10 = vcmp.lt.s32.totalorder %v296_v20, %v297_v44  ;;  %v313_v27 = vrot.slane %v312_v25, 2  ;;  %v336_v4 = vrot.slane %v320_v34, %v328_v26 }
  0x4d   :  { %vm285_vm3 = vcmp.lt.s32.totalorder %v283_v19, %v284_v24  ;;  %v299_v30 = vsel %vm298_vm10, %v296_v20, %v297_v44 }
  0x4e   :  { %v286_v36 = vsel %vm285_vm3, %v283_v19, %v284_v24  ;;  %v300_v50 = vrot.slane %v299_v30, 1  ;;  %vm314_vm6 = vcmp.lt.s32.totalorder %v312_v25, %v313_v27  ;;  %v351_v7 = vcombine.low %v329_v52, %v336_v4 }
  0x4f   :  { %v315_v51 = vsel %vm314_vm6, %v312_v25, %v313_v27  ;;  %v321_v3 = vcombine.low %v270_v35, %v286_v36 }
  0x50   :  { %vm301_vm11 = vcmp.lt.s32.totalorder %v299_v30, %v300_v50  ;;  %v316_v45 = vrot.slane %v315_v51, 1  ;;  %v359_v12 = vrot.slane %v351_v7, %v328_v26 }
  0x51   :  { %v302_v46 = vsel %vm301_vm11, %v299_v30, %v300_v50  ;;  %v343_v18 = vrot.slane %v321_v3, %v328_v26 }
  0x52   :  { %vm317_vm1 = vcmp.lt.s32.totalorder %v315_v51, %v316_v45 }
  0x53   :  { %v318_v5 = vsel %vm317_vm1, %v315_v51, %v316_v45 }
  0x54   :  { %v322_v6 = vcombine.low %v302_v46, %v318_v5 }
  0x56   :  { %v350_v10 = vrot.slane %v322_v6, %v328_v26 }
  0x58   :  { %v352_v11 = vcombine.low %v343_v18, %v350_v10 }
  0x5a   :  { %v366_v13 = vrot.slane %v352_v11, %v328_v26 }
  0x5c   :  { %v367_v15 = vcombine.low %v359_v12, %v366_v13 }
  0x5e   :  { %368 = vst [vmem:[#allocation2] sm:$0xff] %v367_v15 }
  0x5f   :  { %396 = shalt.err (!%p393_p4)
}
  0x60   :  { %s397_s16 = scalar_lea.hbm %s883_s1, 128 }
  0x61   :  { %p398_p5 = scmp.ne.s32.totalorder %s883_s1, %s397_s16  ;;  %p401_p6 = scmp.lt.u32.totalorder %s397_s16, %s883_s1 }
  0x63   :  { %p403_p7 = pnand %p401_p6, %p398_p5 }
  0x65   :  { %406 = shalt.err (!%p403_p7)
}
  0x66   :  { %378 = dma.vmem_to_hbm [thread:$0]  %s376_s12, 128, %s883_s1, [#allocation3]  }
  0x67   :  { %407 = dma.done.wait [#allocation3], 128  }
  0x68   :  { %408 = vsyncadd [#allocation3], 4294967168 }
  0x69   :  { %382 = vsyncpa [#allocation3], 1 }

</bundles_post_ra>
